<compile_context>
chip_gen: v5e
topology: v5e:2x2
jax: 0.10.0
libtpu: 0.0.40
codegen_flags: <defaults>
</compile_context>

<pallas_src>
import functools

import jax
import jax.numpy as jnp
from jax.experimental import pallas as pl
from jax.experimental.pallas import tpu as pltpu


def _round_up(x, m):
    return (x + m - 1) // m * m


def _pick_tiles(m, k, cout):
    """Choose (tm, tn, tk) adaptively; keep lane (128) / sublane (8) alignment."""
    tm = 256 if m >= 256 else _round_up(m, 8)
    tn = 256 if cout > 128 else 128
    tk = min(512, _round_up(k, 128))
    return tm, tn, tk


def _matmul_bias_relu_kernel(a_ref, b_ref, bias_ref, o_ref, acc_ref):
    """acc += a @ b over the K grid axis; bias-add + ReLU on the last K step."""
    k = pl.program_id(2)

    @pl.when(k == 0)
    def _():
        acc_ref[...] = jnp.zeros_like(acc_ref)

    acc_ref[...] += jnp.dot(a_ref[...], b_ref[...],
                            preferred_element_type=jnp.float32)

    @pl.when(k == pl.num_programs(2) - 1)
    def _():
        y = acc_ref[...] + bias_ref[...]
        o_ref[...] = jnp.maximum(y, 0.0).astype(o_ref.dtype)


def _im2col_nhwc(x, kh, kw, stride, padding):
    """x: (N, Cin, H, W) -> patches (N*Ho*Wo, kh*kw*Cin) bf16, (i, j, c) K-order."""
    n, cin, h, w = x.shape
    ho = (h + 2 * padding - kh) // stride + 1
    wo = (w + 2 * padding - kw) // stride + 1
    # Cast to bf16 at original size so the kh*kw-expanded slab is half-width.
    x_nhwc = jnp.transpose(x, (0, 2, 3, 1)).astype(jnp.bfloat16)
    xp = jnp.pad(x_nhwc, ((0, 0), (padding, padding), (padding, padding), (0, 0)))
    cols = []
    for i in range(kh):
        for j in range(kw):
            cols.append(xp[:, i:i + stride * ho:stride, j:j + stride * wo:stride, :])
    patches = jnp.concatenate(cols, axis=-1)          # (N, Ho, Wo, kh*kw*Cin)
    return patches.reshape(n * ho * wo, kh * kw * cin), ho, wo


@functools.partial(jax.jit, static_argnames=("stride", "padding", "eps"))
def base_conv2d(x, weight, gamma, beta, running_mean, running_var,
                *, stride=1, padding=1, eps=1e-5):
    """Forward of BaseConv2d.  x: (N, Cin, H, W) NCHW f32; returns NCHW f32."""
    n, cin, h, w = x.shape
    cout, _, kh, kw = weight.shape

    # Fold BN scale into the (tiny) conv weight in f32; bias stays for the
    # kernel epilogue.
    scale = gamma / jnp.sqrt(running_var + eps)                    # (Cout,)
    bias = beta - running_mean * scale                             # (Cout,)
    w_folded = weight * scale[:, None, None, None]                 # (Cout,Cin,kh,kw)
    # Reorder to match the (i, j, c) K-ordering of the NHWC patches.
    b_mat = jnp.transpose(w_folded, (2, 3, 1, 0)).reshape(kh * kw * cin, cout)

    a, ho, wo = _im2col_nhwc(x, kh, kw, stride, padding)           # (M, K) bf16
    m, k = a.shape
    tm, tn, tk = _pick_tiles(m, k, cout)

    # Pad to MXU / lane-friendly multiples; bf16 operands, f32 accumulation.
    mp = _round_up(m, tm)
    kp = _round_up(k, tk)
    cp = _round_up(cout, tn)
    a_p = jnp.pad(a, ((0, mp - m), (0, kp - k)))
    b_p = jnp.pad(b_mat, ((0, kp - k), (0, cp - cout))).astype(jnp.bfloat16)
    bias_p = jnp.pad(bias, (0, cp - cout)).reshape(1, cp).astype(jnp.float32)

    grid = (mp // tm, cp // tn, kp // tk)
    cost = pl.CostEstimate(
        flops=2 * mp * kp * cp,
        bytes_accessed=mp * kp * 2 + kp * cp * 2 + mp * cp * 4 + cp * 4,
        transcendentals=0)

    out_flat = pl.pallas_call(
        _matmul_bias_relu_kernel,
        out_shape=jax.ShapeDtypeStruct((mp, cp), jnp.float32),
        grid_spec=pltpu.PrefetchScalarGridSpec(
            num_scalar_prefetch=0,
            grid=grid,
            in_specs=[
                pl.BlockSpec((tm, tk), lambda i, j, kk: (i, kk)),
                pl.BlockSpec((tk, tn), lambda i, j, kk: (kk, j)),
                pl.BlockSpec((1, tn), lambda i, j, kk: (0, j)),
            ],
            out_specs=pl.BlockSpec((tm, tn), lambda i, j, kk: (i, j)),
            scratch_shapes=[pltpu.VMEM((tm, tn), jnp.float32)]),
        compiler_params=pltpu.CompilerParams(
            dimension_semantics=("parallel", "parallel", "arbitrary"),
            vmem_limit_bytes=32 * 1024 * 1024),
        cost_estimate=cost,
    )(a_p, b_p, bias_p)

    # Slice off padding; (M, Cout) -> (N, Cout, Ho, Wo).  The module contract
    # is NCHW, so transpose back here.
    out = out_flat[:m, :cout].reshape(n, ho, wo, cout)
    return jnp.transpose(out, (0, 3, 1, 2))


if __name__ == "__main__":
    key = jax.random.PRNGKey(0)
    k_x, k_w, k_g, k_b, k_m, k_v = jax.random.split(key, 6)

    # Small shapes consistent with BaseConv2d(in_channels=4, out_channels=8,
    # kernel_size=3, stride=1, padding=1).
    N, Cin, H, W = 2, 4, 16, 16
    Cout, KH, KW = 8, 3, 3

    x = jax.random.normal(k_x, (N, Cin, H, W), dtype=jnp.float32)
    weight = jax.random.normal(k_w, (Cout, Cin, KH, KW), dtype=jnp.float32) * 0.1
    gamma = jax.random.normal(k_g, (Cout,), dtype=jnp.float32) * 0.1 + 1.0
    beta = jax.random.normal(k_b, (Cout,), dtype=jnp.float32) * 0.1
    running_mean = jax.random.normal(k_m, (Cout,), dtype=jnp.float32) * 0.1
    running_var = jax.random.uniform(k_v, (Cout,), dtype=jnp.float32,
                                     minval=0.5, maxval=1.5)

    out = base_conv2d(x, weight, gamma, beta, running_mean, running_var,
                      stride=1, padding=1)
    jax.block_until_ready(out)

    # Sanity check against a pure-JAX f32 reference (kernel uses bf16 MXU
    # operands with f32 accumulation, so tolerances are relaxed accordingly).
    ref_conv = jax.lax.conv_general_dilated(
        x, weight, window_strides=(1, 1), padding=((1, 1), (1, 1)),
        dimension_numbers=("NCHW", "OIHW", "NCHW"))
    ref_scale = gamma / jnp.sqrt(running_var + 1e-5)
    ref_bias = beta - running_mean * ref_scale
    ref = jnp.maximum(ref_conv * ref_scale[None, :, None, None]
                      + ref_bias[None, :, None, None], 0.0)
    assert out.shape == (N, Cout, H, W)
    assert jnp.allclose(out, ref, atol=5e-2, rtol=2e-2), (
        float(jnp.max(jnp.abs(out - ref))))

    print("KERNEL_OK")
</pallas_src>

<mosaic_0001>
module attributes {stable_mosaic.version = 11 : i64} {
  func.func @_matmul_bias_relu_kernel(%arg0: i32, %arg1: i32, %arg2: i32, %arg3: memref<256x128xbf16, #tpu.memory_space<vmem>>, %arg4: memref<128x128xbf16, #tpu.memory_space<vmem>>, %arg5: memref<1x128xf32, #tpu.memory_space<vmem>>, %arg6: memref<256x128xf32, #tpu.memory_space<vmem>>, %arg7: memref<256x128xf32, #tpu.memory_space<vmem>>) attributes {dimension_semantics = [#tpu.dimension_semantics<parallel>, #tpu.dimension_semantics<parallel>, #tpu.dimension_semantics<arbitrary>], iteration_bounds = array<i64: 2, 1, 1>, scalar_prefetch = 0 : i64, scratch_operands = 1 : i64, tpu.core_type = #tpu.core_type<tc>, window_params = [{transform_indices = @transform_0, window_bounds = array<i64: 256, 128>}, {transform_indices = @transform_1, window_bounds = array<i64: 128, 128>}, {transform_indices = @transform_2, window_bounds = array<i64: 1, 128>}, {transform_indices = @transform_3, window_bounds = array<i64: 256, 128>}]} {
    %c0_i32 = arith.constant 0 : i32
    %0 = arith.cmpi eq, %arg2, %c0_i32 : i32
    %1 = arith.extui %0 : i1 to i32
    %c0_i32_0 = arith.constant 0 : i32
    %2 = arith.cmpi ne, %1, %c0_i32_0 : i32
    scf.if %2 {
      %cst_10 = arith.constant 0.000000e+00 : f32
      %12 = vector.broadcast %cst_10 : f32 to vector<256x128xf32>
      %c0_11 = arith.constant 0 : index
      %c0_12 = arith.constant 0 : index
      %13 = vector.load %arg7[%c0_11, %c0_12] : memref<256x128xf32, #tpu.memory_space<vmem>>, vector<256x128xf32>
      tpu.vector_store %arg7[%c0_11, %c0_12], %12 {strides = array<i32>} : memref<256x128xf32, #tpu.memory_space<vmem>>, vector<256x128xf32>,
    } else {
    }
    %c0 = arith.constant 0 : index
    %c0_1 = arith.constant 0 : index
    %3 = vector.load %arg7[%c0, %c0_1] : memref<256x128xf32, #tpu.memory_space<vmem>>, vector<256x128xf32>
    %c0_2 = arith.constant 0 : index
    %c0_3 = arith.constant 0 : index
    %4 = vector.load %arg3[%c0_2, %c0_3] : memref<256x128xbf16, #tpu.memory_space<vmem>>, vector<256x128xbf16>
    %c0_4 = arith.constant 0 : index
    %c0_5 = arith.constant 0 : index
    %5 = vector.load %arg4[%c0_4, %c0_5] : memref<128x128xbf16, #tpu.memory_space<vmem>>, vector<128x128xbf16>
    %cst = arith.constant dense<0.000000e+00> : vector<256x128xf32>
    %6 = tpu.matmul %4, %5, %cst {dimension_numbers = #tpu.dot_dimension_numbers<[1], [0], [0], [1], [0, 0, 1, 1], [], []>} : vector<256x128xbf16>, vector<128x128xbf16>, vector<256x128xf32> -> vector<256x128xf32>
    %7 = arith.addf %3, %6 : vector<256x128xf32>
    %c0_6 = arith.constant 0 : index
    %c0_7 = arith.constant 0 : index
    %8 = vector.load %arg7[%c0_6, %c0_7] : memref<256x128xf32, #tpu.memory_space<vmem>>, vector<256x128xf32>
    tpu.vector_store %arg7[%c0_6, %c0_7], %7 {strides = array<i32>} : memref<256x128xf32, #tpu.memory_space<vmem>>, vector<256x128xf32>,
    %c0_i32_8 = arith.constant 0 : i32
    %9 = arith.cmpi eq, %arg2, %c0_i32_8 : i32
    %10 = arith.extui %9 : i1 to i32
    %c0_i32_9 = arith.constant 0 : i32
    %11 = arith.cmpi ne, %10, %c0_i32_9 : i32
    scf.if %11 {
      %c0_10 = arith.constant 0 : index
      %c0_11 = arith.constant 0 : index
      %12 = vector.load %arg7[%c0_10, %c0_11] : memref<256x128xf32, #tpu.memory_space<vmem>>, vector<256x128xf32>
      %c0_12 = arith.constant 0 : index
      %c0_13 = arith.constant 0 : index
      %13 = vector.load %arg5[%c0_12, %c0_13] : memref<1x128xf32, #tpu.memory_space<vmem>>, vector<1x128xf32>
      %14 = vector.broadcast %13 : vector<1x128xf32> to vector<256x128xf32>
      %15 = arith.addf %12, %14 : vector<256x128xf32>
      %cst_14 = arith.constant 0.000000e+00 : f32
      %16 = vector.broadcast %cst_14 : f32 to vector<256x128xf32>
      %17 = arith.maximumf %15, %16 : vector<256x128xf32>
      %c0_15 = arith.constant 0 : index
      %c0_16 = arith.constant 0 : index
      %18 = vector.load %arg6[%c0_15, %c0_16] : memref<256x128xf32, #tpu.memory_space<vmem>>, vector<256x128xf32>
      tpu.vector_store %arg6[%c0_15, %c0_16], %17 {strides = array<i32>} : memref<256x128xf32, #tpu.memory_space<vmem>>, vector<256x128xf32>,
    } else {
    }
    return
  }
  func.func @transform_0(%arg0: i32, %arg1: i32, %arg2: i32) -> (i32, i32) {
    %c0_i32 = arith.constant 0 : i32
    return %arg0, %arg2 : i32, i32
  }
  func.func @transform_1(%arg0: i32, %arg1: i32, %arg2: i32) -> (i32, i32) {
    %c0_i32 = arith.constant 0 : i32
    return %arg2, %arg1 : i32, i32
  }
  func.func @transform_2(%arg0: i32, %arg1: i32, %arg2: i32) -> (i32, i32) {
    %c0_i32 = arith.constant 0 : i32
    %c0_i32_0 = arith.constant 0 : i32
    return %c0_i32, %arg1 : i32, i32
  }
  func.func @transform_3(%arg0: i32, %arg1: i32, %arg2: i32) -> (i32, i32) {
    %c0_i32 = arith.constant 0 : i32
    return %arg0, %arg1 : i32, i32
  }
}

</mosaic_0001>

<bundles_post_ra>
// kernel: base_conv2d.1
= control target key start
LH: loop header
LB: loop body
LE: loop exit
PB: predicated region body
PF: predicated region fallthrough
CT: control target
= control target key end

     0   :  { %s1144_s12 = smov 0   ;;  %s1146_s13 = smov 0   ;;  %s1297_s0 = inlined_call_operand.vmem [shape: bf16[512,128], index: 0, kind: input, shape index: {}]   ;;  %s1298_s1 = inlined_call_operand.vmem [shape: bf16[128,128], index: 1, kind: input, shape index: {}]   ;;  %s1299_s2 = inlined_call_operand.vmem [shape: f32[1,128], index: 2, kind: input, shape index: {}]   ;;  %s1300_s3 = inlined_call_operand.vmem [shape: f32[512,128], index: 3, kind: output, shape index: {}]  }
   0x1   :  { %s1148_s14 = smov 0  }
   0x2 LB: > { %s32_s15 = sadd.s32 1, %s1118_s13  ;;  %p924_p0 = scmp.ge.s32.totalorder %s1122_s14, 1  ;;  %s1122_s14 = sphi %s1148_s14, %s13_s14   ;;  %s1118_s13 = sphi %s1146_s13, %s1302_s13   ;;  %s1114_s12 = sphi %s1144_s12, %s1301_s12  }
   0x3   : > { %p34_p1 = scmp.ge.s32.totalorder %s32_s15, 2  ;;  %p188_p2 = scmp.lt.s32.totalorder %s1122_s14, 3 }
   0x5   : > { %s1304_s15 = smov (%p34_p1, %s32_s15), 0  ;;  %p189_p3 = pnand %p924_p0, %p188_p2 }
   0x6   : > { %s925_s24 = sshll.u32 (!%p189_p3), %s1114_s12, 5 }
   0x7   : > { %192 = sbr.rel (%p189_p3) target bundleno = 239 (0xef), region = 32  ;;  %p230_p4 = scmp.lt.s32.totalorder (!%p189_p3), %s925_s24, 63 }
   0xc   : > { %v1050_v0 = vld [vmem:[%s1298_s1 + $0x38] sm:$0xff]  ;;  %v1049_v1 = vld [vmem:[%s1298_s1 + $0x30] sm:$0xff]  ;;  %v1048_v2 = vld [vmem:[%s1298_s1 + $0x28] sm:$0xff]  ;;  %s1306_s24 = smov (!%p230_p4, %s925_s24), 63 }
   0xd   : > { %519 = vmatpush.bf16.msra.mxu0 %v1050_v0  ;;  %1051 = vmatpush.bf16.msra.mxu1 %v1050_v0  ;;  %v1047_v3 = vld [vmem:[%s1298_s1 + $0x20] sm:$0xff]  ;;  %v1046_v4 = vld [vmem:[%s1298_s1 + $0x18] sm:$0xff]  ;;  %v1045_v5 = vld [vmem:[%s1298_s1 + $0x10] sm:$0xff]  ;;  %s926_s4 = sshll.u32 %s1306_s24, 2  ;;  %s928_s12 = sshll.u32 %s1306_s24, 3 }
   0xe   : > { %1052 = vmatpush.bf16.msra.mxu2 %v1050_v0  ;;  %1053 = vmatpush.bf16.msra.mxu3 %v1050_v0  ;;  %v1044_v6 = vld [vmem:[%s1298_s1 + $0x8] sm:$0xff]  ;;  %v1043_v7 = vld [vmem:[%s1298_s1] sm:$0xff]  ;;  %s1195_s9 = scalar_lea.vmem %s1297_s0, %s926_s4  ;;  %s1224_s18 = scalar_lea.vmem %s1300_s3, %s928_s12 }
   0xf   : > { %v1027_v8 = vld [vmem:[%s1195_s9] sm:$0xff]  ;;  %v1028_v12 = vld [vmem:[%s1195_s9 + $0x8] sm:$0xff]  ;;  %v1029_v16 = vld [vmem:[%s1195_s9 + $0x10] sm:$0xff] }
  0x10   : > { %v1031_v9 = vld [vmem:[%s1195_s9 + $0x20] sm:$0xff]  ;;  %v1032_v13 = vld [vmem:[%s1195_s9 + $0x28] sm:$0xff]  ;;  %v1033_v17 = vld [vmem:[%s1195_s9 + $0x30] sm:$0xff] }
  0x11   : > { %520 = vmatpush.bf16.msra.mxu0 %v1049_v1  ;;  %1054 = vmatpush.bf16.msra.mxu1 %v1049_v1  ;;  %v1035_v10 = vld [vmem:[%s1195_s9 + $0x40] sm:$0xff]  ;;  %v1036_v14 = vld [vmem:[%s1195_s9 + $0x48] sm:$0xff]  ;;  %v1037_v18 = vld [vmem:[%s1195_s9 + $0x50] sm:$0xff] }
  0x12   : > { %1055 = vmatpush.bf16.msra.mxu2 %v1049_v1  ;;  %1056 = vmatpush.bf16.msra.mxu3 %v1049_v1  ;;  %v1039_v11 = vld [vmem:[%s1195_s9 + $0x60] sm:$0xff]  ;;  %v1040_v15 = vld [vmem:[%s1195_s9 + $0x68] sm:$0xff]  ;;  %v1041_v19 = vld [vmem:[%s1195_s9 + $0x70] sm:$0xff] }
  0x13   : > { %v1030_v20 = vld [vmem:[%s1195_s9 + $0x18] sm:$0xff]  ;;  %v1216_v24 = vld [vmem:[%s1299_s2] ss:$0 sm:$0xff] }
  0x14   : > { %v1034_v21 = vld [vmem:[%s1195_s9 + $0x38] sm:$0xff] }
  0x15   : > { %521 = vmatpush.bf16.msra.mxu0 %v1048_v2  ;;  %1057 = vmatpush.bf16.msra.mxu1 %v1048_v2  ;;  %v1038_v22 = vld [vmem:[%s1195_s9 + $0x58] sm:$0xff] }
  0x16   : > { %1058 = vmatpush.bf16.msra.mxu2 %v1048_v2  ;;  %1059 = vmatpush.bf16.msra.mxu3 %v1048_v2  ;;  %v1042_v23 = vld [vmem:[%s1195_s9 + $0x78] sm:$0xff] }
  0x19   : > { %522 = vmatpush.bf16.msra.mxu0 %v1047_v3  ;;  %1060 = vmatpush.bf16.msra.mxu1 %v1047_v3 }
  0x1a   : > { %1061 = vmatpush.bf16.msra.mxu2 %v1047_v3  ;;  %1062 = vmatpush.bf16.msra.mxu3 %v1047_v3 }
  0x1d   : > { %523 = vmatpush.bf16.msra.mxu0 %v1046_v4  ;;  %1063 = vmatpush.bf16.msra.mxu1 %v1046_v4 }
  0x1e   : > { %1064 = vmatpush.bf16.msra.mxu2 %v1046_v4  ;;  %1065 = vmatpush.bf16.msra.mxu3 %v1046_v4 }
  0x21   : > { %524 = vmatpush.bf16.msra.mxu0 %v1045_v5  ;;  %1066 = vmatpush.bf16.msra.mxu1 %v1045_v5 }
  0x22   : > { %1067 = vmatpush.bf16.msra.mxu2 %v1045_v5  ;;  %1068 = vmatpush.bf16.msra.mxu3 %v1045_v5 }
  0x25   : > { %525 = vmatpush.bf16.msra.mxu0 %v1044_v6  ;;  %1069 = vmatpush.bf16.msra.mxu1 %v1044_v6 }
  0x26   : > { %1070 = vmatpush.bf16.msra.mxu2 %v1044_v6  ;;  %1071 = vmatpush.bf16.msra.mxu3 %v1044_v6 }
  0x29   : > { %526 = vmatpush.bf16.msra.mxu0 %v1043_v7  ;;  %1072 = vmatpush.bf16.msra.mxu1 %v1043_v7 }
  0x2a   : > { %1073 = vmatpush.bf16.msra.mxu2 %v1043_v7  ;;  %1074 = vmatpush.bf16.msra.mxu3 %v1043_v7 }
  0x2c   : > { %527 = vmatmul.bf16.vlgmr.msra.gmra.mxu0 %v1027_v8  ;;  %547 = vmatmul.bf16.vlgmr.msra.gmra.mxu1 %v1031_v9 }
  0x2d   : > { %567 = vmatmul.bf16.vlgmr.msra.gmra.mxu2 %v1035_v10  ;;  %587 = vmatmul.bf16.vlgmr.msra.gmra.mxu3 %v1039_v11 }
  0x3c   : > { %532 = vmatmul.bf16.gmra.mxu0 %v1028_v12  ;;  %552 = vmatmul.bf16.gmra.mxu1 %v1032_v13 }
  0x3d   : > { %572 = vmatmul.bf16.gmra.mxu2 %v1036_v14  ;;  %592 = vmatmul.bf16.gmra.mxu3 %v1040_v15 }
  0x4c   : > { %537 = vmatmul.bf16.gmra.mxu0 %v1029_v16  ;;  %557 = vmatmul.bf16.gmra.mxu1 %v1033_v17 }
  0x4d   : > { %577 = vmatmul.bf16.gmra.mxu2 %v1037_v18  ;;  %597 = vmatmul.bf16.gmra.mxu3 %v1041_v19 }
  0x5c   : > { %542 = vmatmul.bf16.gmra.mxu0 %v1030_v20  ;;  %562 = vmatmul.bf16.gmra.mxu1 %v1034_v21 }
  0x5d   : > { %582 = vmatmul.bf16.gmra.mxu2 %v1038_v22  ;;  %602 = vmatmul.bf16.gmra.mxu3 %v1042_v23 }
  0xa9   : > { %v528_v25 = vpop.f32.mrf.mxu0  ;;  %v548_v26 = vpop.f32.mrf.mxu1 }
  0xaa   : > { %v711_v27 = vadd.f32 %v1216_v24, %v528_v25  ;;  %v719_v28 = vadd.f32 %v1216_v24, %v548_v26 }
  0xac   : > { %v743_v29 = vmax.f32 %v711_v27, 0.0  ;;  %v751_v30 = vmax.f32 %v719_v28, 0.0 }
  0xae   : > { %775 = vst [vmem:[%s1224_s18] sm:$0xff] %v743_v29 }
  0xaf   : > { %783 = vst [vmem:[%s1224_s18 + $0x40] sm:$0xff] %v751_v30 }
  0xb0   : > { %v568_v31 = vpop.f32.mrf.mxu2  ;;  %v588_v32 = vpop.f32.mrf.mxu3 }
  0xb1   : > { %v727_v33 = vadd.f32 %v1216_v24, %v568_v31  ;;  %v735_v34 = vadd.f32 %v1216_v24, %v588_v32  ;;  %v530_v35 = vpop.f32.mrf.mxu0  ;;  %v550_v36 = vpop.f32.mrf.mxu1 }
  0xb2   : > { %v712_v37 = vadd.f32 %v1216_v24, %v530_v35  ;;  %v720_v38 = vadd.f32 %v1216_v24, %v550_v36 }
  0xb3   : > { %v759_v39 = vmax.f32 %v727_v33, 0.0  ;;  %v767_v40 = vmax.f32 %v735_v34, 0.0 }
  0xb4   : > { %v744_v41 = vmax.f32 %v712_v37, 0.0  ;;  %v752_v42 = vmax.f32 %v720_v38, 0.0 }
  0xb5   : > { %791 = vst [vmem:[%s1224_s18 + $0x80] sm:$0xff] %v759_v39 }
  0xb6   : > { %799 = vst [vmem:[%s1224_s18 + $0xc0] sm:$0xff] %v767_v40 }
  0xb7   : > { %776 = vst [vmem:[%s1224_s18 + $0x8] sm:$0xff] %v744_v41 }
  0xb8   : > { %784 = vst [vmem:[%s1224_s18 + $0x48] sm:$0xff] %v752_v42  ;;  %v570_v43 = vpop.f32.mrf.mxu2  ;;  %v590_v44 = vpop.f32.mrf.mxu3 }
  0xb9   : > { %v728_v45 = vadd.f32 %v1216_v24, %v570_v43  ;;  %v736_v46 = vadd.f32 %v1216_v24, %v590_v44  ;;  %v533_v47 = vpop.f32.mrf.mxu0  ;;  %v553_v48 = vpop.f32.mrf.mxu1 }
  0xba   : > { %v713_v49 = vadd.f32 %v1216_v24, %v533_v47  ;;  %v721_v50 = vadd.f32 %v1216_v24, %v553_v48 }
  0xbb   : > { %v760_v51 = vmax.f32 %v728_v45, 0.0  ;;  %v768_v52 = vmax.f32 %v736_v46, 0.0 }
  0xbc   : > { %v745_v53 = vmax.f32 %v713_v49, 0.0  ;;  %v753_v54 = vmax.f32 %v721_v50, 0.0 }
  0xbd   : > { %792 = vst [vmem:[%s1224_s18 + $0x88] sm:$0xff] %v760_v51 }
  0xbe   : > { %800 = vst [vmem:[%s1224_s18 + $0xc8] sm:$0xff] %v768_v52 }
  0xbf   : > { %777 = vst [vmem:[%s1224_s18 + $0x10] sm:$0xff] %v745_v53 }
  0xc0   : > { %785 = vst [vmem:[%s1224_s18 + $0x50] sm:$0xff] %v753_v54  ;;  %v573_v55 = vpop.f32.mrf.mxu2  ;;  %v593_v56 = vpop.f32.mrf.mxu3 }
  0xc1   : > { %v729_v57 = vadd.f32 %v1216_v24, %v573_v55  ;;  %v737_v58 = vadd.f32 %v1216_v24, %v593_v56  ;;  %v535_v59 = vpop.f32.mrf.mxu0  ;;  %v555_v60 = vpop.f32.mrf.mxu1 }
  0xc2   : > { %v714_v61 = vadd.f32 %v1216_v24, %v535_v59  ;;  %v722_v62 = vadd.f32 %v1216_v24, %v555_v60 }
  0xc3   : > { %v761_v63 = vmax.f32 %v729_v57, 0.0  ;;  %v769_v0 = vmax.f32 %v737_v58, 0.0 }
  0xc4   : > { %v746_v1 = vmax.f32 %v714_v61, 0.0  ;;  %v754_v2 = vmax.f32 %v722_v62, 0.0 }
  0xc5   : > { %793 = vst [vmem:[%s1224_s18 + $0x90] sm:$0xff] %v761_v63 }
  0xc6   : > { %801 = vst [vmem:[%s1224_s18 + $0xd0] sm:$0xff] %v769_v0 }
  0xc7   : > { %778 = vst [vmem:[%s1224_s18 + $0x18] sm:$0xff] %v746_v1 }
  0xc8   : > { %786 = vst [vmem:[%s1224_s18 + $0x58] sm:$0xff] %v754_v2  ;;  %v575_v3 = vpop.f32.mrf.mxu2  ;;  %v595_v4 = vpop.f32.mrf.mxu3 }
  0xc9   : > { %v730_v5 = vadd.f32 %v1216_v24, %v575_v3  ;;  %v738_v6 = vadd.f32 %v1216_v24, %v595_v4  ;;  %v538_v7 = vpop.f32.mrf.mxu0  ;;  %v558_v8 = vpop.f32.mrf.mxu1 }
  0xca   : > { %v715_v9 = vadd.f32 %v1216_v24, %v538_v7  ;;  %v723_v10 = vadd.f32 %v1216_v24, %v558_v8 }
  0xcb   : > { %v762_v11 = vmax.f32 %v730_v5, 0.0  ;;  %v770_v12 = vmax.f32 %v738_v6, 0.0 }
  0xcc   : > { %v747_v13 = vmax.f32 %v715_v9, 0.0  ;;  %v755_v14 = vmax.f32 %v723_v10, 0.0 }
  0xcd   : > { %794 = vst [vmem:[%s1224_s18 + $0x98] sm:$0xff] %v762_v11 }
  0xce   : > { %802 = vst [vmem:[%s1224_s18 + $0xd8] sm:$0xff] %v770_v12 }
  0xcf   : > { %779 = vst [vmem:[%s1224_s18 + $0x20] sm:$0xff] %v747_v13 }
  0xd0   : > { %787 = vst [vmem:[%s1224_s18 + $0x60] sm:$0xff] %v755_v14  ;;  %v578_v15 = vpop.f32.mrf.mxu2  ;;  %v598_v16 = vpop.f32.mrf.mxu3 }
  0xd1   : > { %v731_v17 = vadd.f32 %v1216_v24, %v578_v15  ;;  %v739_v18 = vadd.f32 %v1216_v24, %v598_v16  ;;  %v540_v19 = vpop.f32.mrf.mxu0  ;;  %v560_v20 = vpop.f32.mrf.mxu1 }
  0xd2   : > { %v716_v21 = vadd.f32 %v1216_v24, %v540_v19  ;;  %v724_v22 = vadd.f32 %v1216_v24, %v560_v20 }
  0xd3   : > { %v763_v23 = vmax.f32 %v731_v17, 0.0  ;;  %v771_v25 = vmax.f32 %v739_v18, 0.0 }
  0xd4   : > { %v748_v26 = vmax.f32 %v716_v21, 0.0  ;;  %v756_v27 = vmax.f32 %v724_v22, 0.0 }
  0xd5   : > { %795 = vst [vmem:[%s1224_s18 + $0xa0] sm:$0xff] %v763_v23 }
  0xd6   : > { %803 = vst [vmem:[%s1224_s18 + $0xe0] sm:$0xff] %v771_v25 }
  0xd7   : > { %780 = vst [vmem:[%s1224_s18 + $0x28] sm:$0xff] %v748_v26 }
  0xd8   : > { %788 = vst [vmem:[%s1224_s18 + $0x68] sm:$0xff] %v756_v27  ;;  %v580_v28 = vpop.f32.mrf.mxu2  ;;  %v600_v29 = vpop.f32.mrf.mxu3 }
  0xd9   : > { %v732_v30 = vadd.f32 %v1216_v24, %v580_v28  ;;  %v740_v31 = vadd.f32 %v1216_v24, %v600_v29  ;;  %v543_v32 = vpop.f32.mrf.mxu0  ;;  %v563_v33 = vpop.f32.mrf.mxu1 }
  0xda   : > { %v717_v34 = vadd.f32 %v1216_v24, %v543_v32  ;;  %v725_v35 = vadd.f32 %v1216_v24, %v563_v33 }
  0xdb   : > { %v764_v36 = vmax.f32 %v732_v30, 0.0  ;;  %v772_v37 = vmax.f32 %v740_v31, 0.0 }
  0xdc   : > { %v749_v38 = vmax.f32 %v717_v34, 0.0  ;;  %v757_v39 = vmax.f32 %v725_v35, 0.0 }
  0xdd   : > { %796 = vst [vmem:[%s1224_s18 + $0xa8] sm:$0xff] %v764_v36 }
  0xde   : > { %804 = vst [vmem:[%s1224_s18 + $0xe8] sm:$0xff] %v772_v37 }
  0xdf   : > { %781 = vst [vmem:[%s1224_s18 + $0x30] sm:$0xff] %v749_v38 }
  0xe0   : > { %789 = vst [vmem:[%s1224_s18 + $0x70] sm:$0xff] %v757_v39  ;;  %v583_v40 = vpop.f32.mrf.mxu2  ;;  %v603_v41 = vpop.f32.mrf.mxu3 }
  0xe1   : > { %v733_v42 = vadd.f32 %v1216_v24, %v583_v40  ;;  %v741_v43 = vadd.f32 %v1216_v24, %v603_v41  ;;  %v545_v44 = vpop.f32.mrf.mxu0  ;;  %v565_v45 = vpop.f32.mrf.mxu1 }
  0xe2   : > { %v718_v46 = vadd.f32 %v1216_v24, %v545_v44  ;;  %v726_v47 = vadd.f32 %v1216_v24, %v565_v45 }
  0xe3   : > { %v765_v48 = vmax.f32 %v733_v42, 0.0  ;;  %v773_v49 = vmax.f32 %v741_v43, 0.0 }
  0xe4   : > { %v750_v50 = vmax.f32 %v718_v46, 0.0  ;;  %v758_v51 = vmax.f32 %v726_v47, 0.0 }
  0xe5   : > { %797 = vst [vmem:[%s1224_s18 + $0xb0] sm:$0xff] %v765_v48 }
  0xe6   : > { %805 = vst [vmem:[%s1224_s18 + $0xf0] sm:$0xff] %v773_v49 }
  0xe7   : > { %782 = vst [vmem:[%s1224_s18 + $0x38] sm:$0xff] %v750_v50 }
  0xe8   : > { %790 = vst [vmem:[%s1224_s18 + $0x78] sm:$0xff] %v758_v51  ;;  %v585_v52 = vpop.f32.mrf.mxu2  ;;  %v605_v53 = vpop.f32.mrf.mxu3 }
  0xe9   : > { %v734_v54 = vadd.f32 %v1216_v24, %v585_v52  ;;  %v742_v55 = vadd.f32 %v1216_v24, %v605_v53 }
  0xeb   : > { %v766_v56 = vmax.f32 %v734_v54, 0.0  ;;  %v774_v57 = vmax.f32 %v742_v55, 0.0 }
  0xed   : > { %798 = vst [vmem:[%s1224_s18 + $0xb8] sm:$0xff] %v766_v56 }
  0xee   : > { %806 = vst [vmem:[%s1224_s18 + $0xf8] sm:$0xff] %v774_v57 }
  0xef PF: > { %s13_s14 = sadd.s32 1, %s1122_s14   ;;  %s1301_s12 = smov %s1118_s13 }
  0xf0   : > { %p10_p5 = scmp.ge.s32.totalorder %s13_s14, 4   ;;  %s1302_s13 = smov %s1304_s15 }
  0xf2   :  { %12 = sbr.rel (!%p10_p5) target bundleno = 2 (0x2), region = 76 }

</bundles_post_ra>
